<compile_context>
chip_gen: v7x
topology: tpu7x:2x2x1
jax: 0.10.0
libtpu: 0.0.40
codegen_flags: <defaults>
</compile_context>

<pallas_src>
import functools

import jax
import jax.numpy as jnp
from jax.experimental import pallas as pl
from jax.experimental.pallas import tpu as pltpu


def _critic_kernel(x_ref, w1_ref, b1_ref, w2_ref, b2_ref, w3_ref, b3_ref, q_ref):
    # fc1 + ReLU : bf16 MXU operands, f32 accumulate / elementwise.
    h1 = jnp.dot(x_ref[...].astype(jnp.bfloat16),
                 w1_ref[...].astype(jnp.bfloat16),
                 preferred_element_type=jnp.float32)
    h1 = jnp.maximum(h1 + b1_ref[...], 0.0)

    # fc2 + ReLU
    h2 = jnp.dot(h1.astype(jnp.bfloat16),
                 w2_ref[...].astype(jnp.bfloat16),
                 preferred_element_type=jnp.float32)
    h2 = jnp.maximum(h2 + b2_ref[...], 0.0)

    # fc3 (output width 1): VPU multiply + lane reduction (no N=1 MXU matmul).
    # w3_ref is the (1, hidden) row vector; biases broadcast implicitly (no
    # materialized broadcast per grid step).
    q = jnp.sum(h2 * w3_ref[...], axis=-1, keepdims=True) + b3_ref[...]
    q_ref[...] = q.astype(q_ref.dtype)


def _round_up(n, m):
    return ((n + m - 1) // m) * m


@functools.partial(jax.jit, static_argnames=("block_rows",))
def critic_forward(x, w1, b1, w2, b2, w3, b3, *, block_rows=512):
    batch, in_dim = x.shape
    hidden = w1.shape[1]

    # Batch tile: multiple of 8 (sublane rule), capped at block_rows; small batches
    # run as a single tile. Pad ragged batches up to a whole number of tiles.
    tb = min(block_rows, _round_up(batch, 8))
    padded = _round_up(batch, tb)
    if padded != batch:
        x = jnp.pad(x, ((0, padded - batch), (0, 0)))
    n_tiles = padded // tb

    const = lambda i: (0, 0)  # weights / biases: constant block -> VMEM-resident
    q = pl.pallas_call(
        _critic_kernel,
        out_shape=jax.ShapeDtypeStruct((padded, 1), jnp.float32),
        grid=(n_tiles,),
        in_specs=[
            pl.BlockSpec((tb, in_dim), lambda i: (i, 0)),   # x: streams per tile
            pl.BlockSpec((in_dim, hidden), const),          # w1
            pl.BlockSpec((1, hidden), const),               # b1
            pl.BlockSpec((hidden, hidden), const),          # w2
            pl.BlockSpec((1, hidden), const),               # b2
            pl.BlockSpec((1, hidden), const),               # w3 (row vector)
            pl.BlockSpec((1, 1), const),                    # b3
        ],
        out_specs=pl.BlockSpec((tb, 1), lambda i: (i, 0)),
        compiler_params=pltpu.CompilerParams(
            dimension_semantics=("parallel",)),             # megacore-shardable on v7x
    )(x, w1, b1, w2, b2, w3, b3)
    return q[:batch]


def init_params(key, input_shape, critic_dim):
    """Deterministic synthetic parameters (PyTorch-style uniform fan-in init)."""
    ks = jax.random.split(key, 6)

    def linear(kw, kb, fan_in, fan_out):
        bound = 1.0 / jnp.sqrt(fan_in)
        w = jax.random.uniform(kw, (fan_in, fan_out), jnp.float32, -bound, bound)
        b = jax.random.uniform(kb, (1, fan_out), jnp.float32, -bound, bound)
        return w, b

    w1, b1 = linear(ks[0], ks[1], input_shape, critic_dim)
    w2, b2 = linear(ks[2], ks[3], critic_dim, critic_dim)
    w3_col, b3 = linear(ks[4], ks[5], critic_dim, 1)
    w3 = w3_col.T  # store fc3 weight as (1, critic_dim) row (same as torch fc3.weight)
    return w1, b1, w2, b2, w3, b3


def _reference_forward(x, w1, b1, w2, b2, w3, b3):
    """Pure-JAX f32 reference, same math as the PyTorch forward."""
    h1 = jnp.maximum(x @ w1 + b1, 0.0)
    h2 = jnp.maximum(h1 @ w2 + b2, 0.0)
    return h2 @ w3.T + b3


if __name__ == "__main__":
    input_shape = 32   # Critic input feature size
    critic_dim = 64    # args.critic_dim

    key = jax.random.PRNGKey(0)
    k_x, k_p, k_x2 = jax.random.split(key, 3)
    params = init_params(k_p, input_shape, critic_dim)

    # Case 1: small batch, single tile, no padding.
    x_small = jax.random.normal(k_x, (8, input_shape), jnp.float32)
    q_small = critic_forward(x_small, *params)
    jax.block_until_ready(q_small)

    # Case 2: ragged batch + multi-tile grid (exercises padding, pipelining and
    # resident weights across grid steps).
    x_big = jax.random.normal(k_x2, (100, input_shape), jnp.float32)
    q_big = critic_forward(x_big, *params, block_rows=32)
    jax.block_until_ready(q_big)

    # Check against the f32 reference; bf16 MXU operands loosen the tolerance slightly.
    for x_in, q_out in ((x_small, q_small), (x_big, q_big)):
        q_ref = _reference_forward(x_in, *params)
        assert q_out.shape == (x_in.shape[0], 1)
        err = float(jnp.max(jnp.abs(q_out - q_ref)))
        assert jnp.allclose(q_out, q_ref, atol=5e-2, rtol=5e-2), err

    print("KERNEL_OK")
</pallas_src>

<mosaic_0001>
module attributes {stable_mosaic.version = 11 : i64} {
  func.func @_critic_kernel(%arg0: i32, %arg1: memref<8x32xf32, #tpu.memory_space<vmem>>, %arg2: memref<32x64xf32, #tpu.memory_space<vmem>>, %arg3: memref<1x64xf32, #tpu.memory_space<vmem>>, %arg4: memref<64x64xf32, #tpu.memory_space<vmem>>, %arg5: memref<1x64xf32, #tpu.memory_space<vmem>>, %arg6: memref<1x64xf32, #tpu.memory_space<vmem>>, %arg7: memref<1x1xf32, #tpu.memory_space<vmem>>, %arg8: memref<8x1xf32, #tpu.memory_space<vmem>>) attributes {dimension_semantics = [#tpu.dimension_semantics<parallel>], iteration_bounds = array<i64: 1>, scalar_prefetch = 0 : i64, scratch_operands = 0 : i64, tpu.core_type = #tpu.core_type<tc>, window_params = [{transform_indices = @transform_0, window_bounds = array<i64: 8, 32>}, {pipeline_mode = #tpu.pipeline_mode<synchronous>, transform_indices = @transform_1, window_bounds = array<i64: 32, 64>}, {pipeline_mode = #tpu.pipeline_mode<synchronous>, transform_indices = @transform_2, window_bounds = array<i64: 1, 64>}, {pipeline_mode = #tpu.pipeline_mode<synchronous>, transform_indices = @transform_3, window_bounds = array<i64: 64, 64>}, {pipeline_mode = #tpu.pipeline_mode<synchronous>, transform_indices = @transform_4, window_bounds = array<i64: 1, 64>}, {pipeline_mode = #tpu.pipeline_mode<synchronous>, transform_indices = @transform_5, window_bounds = array<i64: 1, 64>}, {pipeline_mode = #tpu.pipeline_mode<synchronous>, transform_indices = @transform_6, window_bounds = array<i64: 1, 1>}, {transform_indices = @transform_7, window_bounds = array<i64: 8, 1>}]} {
    %c0 = arith.constant 0 : index
    %c0_0 = arith.constant 0 : index
    %0 = vector.load %arg1[%c0, %c0_0] : memref<8x32xf32, #tpu.memory_space<vmem>>, vector<8x32xf32>
    %1 = arith.truncf %0 : vector<8x32xf32> to vector<8x32xbf16>
    %c0_1 = arith.constant 0 : index
    %c0_2 = arith.constant 0 : index
    %2 = vector.load %arg2[%c0_1, %c0_2] : memref<32x64xf32, #tpu.memory_space<vmem>>, vector<32x64xf32>
    %3 = arith.truncf %2 : vector<32x64xf32> to vector<32x64xbf16>
    %cst = arith.constant dense<0.000000e+00> : vector<8x64xf32>
    %4 = tpu.matmul %1, %3, %cst {dimension_numbers = #tpu.dot_dimension_numbers<[1], [0], [0], [1], [0, 0, 1, 1], [], []>} : vector<8x32xbf16>, vector<32x64xbf16>, vector<8x64xf32> -> vector<8x64xf32>
    %c0_3 = arith.constant 0 : index
    %c0_4 = arith.constant 0 : index
    %5 = vector.load %arg3[%c0_3, %c0_4] : memref<1x64xf32, #tpu.memory_space<vmem>>, vector<1x64xf32>
    %6 = vector.broadcast %5 : vector<1x64xf32> to vector<8x64xf32>
    %7 = arith.addf %4, %6 : vector<8x64xf32>
    %cst_5 = arith.constant 0.000000e+00 : f32
    %8 = vector.broadcast %cst_5 : f32 to vector<8x64xf32>
    %9 = arith.maximumf %7, %8 : vector<8x64xf32>
    %10 = arith.truncf %9 : vector<8x64xf32> to vector<8x64xbf16>
    %c0_6 = arith.constant 0 : index
    %c0_7 = arith.constant 0 : index
    %11 = vector.load %arg4[%c0_6, %c0_7] : memref<64x64xf32, #tpu.memory_space<vmem>>, vector<64x64xf32>
    %12 = arith.truncf %11 : vector<64x64xf32> to vector<64x64xbf16>
    %cst_8 = arith.constant dense<0.000000e+00> : vector<8x64xf32>
    %13 = tpu.matmul %10, %12, %cst_8 {dimension_numbers = #tpu.dot_dimension_numbers<[1], [0], [0], [1], [0, 0, 1, 1], [], []>} : vector<8x64xbf16>, vector<64x64xbf16>, vector<8x64xf32> -> vector<8x64xf32>
    %c0_9 = arith.constant 0 : index
    %c0_10 = arith.constant 0 : index
    %14 = vector.load %arg5[%c0_9, %c0_10] : memref<1x64xf32, #tpu.memory_space<vmem>>, vector<1x64xf32>
    %15 = vector.broadcast %14 : vector<1x64xf32> to vector<8x64xf32>
    %16 = arith.addf %13, %15 : vector<8x64xf32>
    %cst_11 = arith.constant 0.000000e+00 : f32
    %17 = vector.broadcast %cst_11 : f32 to vector<8x64xf32>
    %18 = arith.maximumf %16, %17 : vector<8x64xf32>
    %c0_12 = arith.constant 0 : index
    %c0_13 = arith.constant 0 : index
    %19 = vector.load %arg6[%c0_12, %c0_13] : memref<1x64xf32, #tpu.memory_space<vmem>>, vector<1x64xf32>
    %20 = vector.broadcast %19 : vector<1x64xf32> to vector<8x64xf32>
    %21 = arith.mulf %18, %20 : vector<8x64xf32>
    %cst_14 = arith.constant dense<0.000000e+00> : vector<8xf32>
    %22 = vector.multi_reduction <add>, %21, %cst_14 [1] : vector<8x64xf32> to vector<8xf32>
    %23 = vector.shape_cast %22 : vector<8xf32> to vector<8x1xf32>
    %c0_15 = arith.constant 0 : index
    %c0_16 = arith.constant 0 : index
    %24 = vector.load %arg7[%c0_15, %c0_16] : memref<1x1xf32, #tpu.memory_space<vmem>>, vector<1x1xf32>
    %25 = vector.broadcast %24 : vector<1x1xf32> to vector<8x1xf32>
    %26 = arith.addf %23, %25 : vector<8x1xf32>
    %c0_17 = arith.constant 0 : index
    %c0_18 = arith.constant 0 : index
    %27 = vector.load %arg8[%c0_17, %c0_18] : memref<8x1xf32, #tpu.memory_space<vmem>>, vector<8x1xf32>
    tpu.vector_store %arg8[%c0_17, %c0_18], %26 {strides = array<i32>} : memref<8x1xf32, #tpu.memory_space<vmem>>, vector<8x1xf32>,
    return
  }
  func.func @transform_0(%arg0: i32) -> (i32, i32) {
    %c0_i32 = arith.constant 0 : i32
    %c0_i32_0 = arith.constant 0 : i32
    return %arg0, %c0_i32 : i32, i32
  }
  func.func @transform_1(%arg0: i32) -> (i32, i32) {
    %c0_i32 = arith.constant 0 : i32
    %c0_i32_0 = arith.constant 0 : i32
    %c0_i32_1 = arith.constant 0 : i32
    return %c0_i32, %c0_i32_0 : i32, i32
  }
  func.func @transform_2(%arg0: i32) -> (i32, i32) {
    %c0_i32 = arith.constant 0 : i32
    %c0_i32_0 = arith.constant 0 : i32
    %c0_i32_1 = arith.constant 0 : i32
    return %c0_i32, %c0_i32_0 : i32, i32
  }
  func.func @transform_3(%arg0: i32) -> (i32, i32) {
    %c0_i32 = arith.constant 0 : i32
    %c0_i32_0 = arith.constant 0 : i32
    %c0_i32_1 = arith.constant 0 : i32
    return %c0_i32, %c0_i32_0 : i32, i32
  }
  func.func @transform_4(%arg0: i32) -> (i32, i32) {
    %c0_i32 = arith.constant 0 : i32
    %c0_i32_0 = arith.constant 0 : i32
    %c0_i32_1 = arith.constant 0 : i32
    return %c0_i32, %c0_i32_0 : i32, i32
  }
  func.func @transform_5(%arg0: i32) -> (i32, i32) {
    %c0_i32 = arith.constant 0 : i32
    %c0_i32_0 = arith.constant 0 : i32
    %c0_i32_1 = arith.constant 0 : i32
    return %c0_i32, %c0_i32_0 : i32, i32
  }
  func.func @transform_6(%arg0: i32) -> (i32, i32) {
    %c0_i32 = arith.constant 0 : i32
    %c0_i32_0 = arith.constant 0 : i32
    %c0_i32_1 = arith.constant 0 : i32
    return %c0_i32, %c0_i32_0 : i32, i32
  }
  func.func @transform_7(%arg0: i32) -> (i32, i32) {
    %c0_i32 = arith.constant 0 : i32
    %c0_i32_0 = arith.constant 0 : i32
    return %arg0, %c0_i32 : i32, i32
  }
}

</mosaic_0001>

<bundles_post_ra>
// kernel: critic_forward.1
= control target key start
LH: loop header
LB: loop body
LE: loop exit
PB: predicated region body
PF: predicated region fallthrough
CT: control target
= control target key end

     0   :  { %s435_s0 = inlined_call_operand.hbm [shape: f32[8,32], index: 0, kind: input, shape index: {}]   ;;  %s436_s1 = inlined_call_operand.hbm [shape: f32[32,64], index: 1, kind: input, shape index: {}]   ;;  %s437_s2 = inlined_call_operand.vmem [shape: f32[1,64], index: 2, kind: input, shape index: {}]   ;;  %s438_s3 = inlined_call_operand.hbm [shape: f32[64,64], index: 3, kind: input, shape index: {}]   ;;  %s439_s4 = inlined_call_operand.vmem [shape: f32[1,64], index: 4, kind: input, shape index: {}]   ;;  %s440_s5 = inlined_call_operand.vmem [shape: f32[1,64], index: 5, kind: input, shape index: {}]   ;;  %s441_s6 = inlined_call_operand.<no memory space> [shape: f32[1,1], index: 6, kind: input, shape index: {}]   ;;  %s442_s7 = inlined_call_operand.vmem [shape: f32[8,1], index: 7, kind: output, shape index: {}]  }
   0x1   :  { %v12_v0 = vstv %s441_s6 }
   0x2   :  { %13 = vst [vmem:[#allocation2] sm:$0x1] %v12_v0 }
   0x3   :  { %14 = vsyncpa [#allocation4], 0 }
   0x4   :  { %15 = vsyncpa [#allocation6], 0  ;;  %s331_s26 = smov [#allocation5]   ;;  %s261_s30 = scalar_lea.hbm %s436_s1, 512 }
   0x5   :  { %s31_s27 = sshll.u32 %s331_s26, 4  ;;  %p262_p0 = scmp.ne.s32.totalorder %s436_s1, %s261_s30  ;;  %s32_s27 = int_to_ptr.vmem [resolvable:$true] %s31_s27 }
   0x6   :  { %p265_p1 = scmp.lt.u32.totalorder %s261_s30, %s436_s1 }
   0x8   :  { %p267_p2 = pnand %p265_p1, %p262_p0 }
   0xa   :  { %270 = shalt.err (!%p267_p2)
}
   0xb   :  { %s271_s6 = scalar_lea.vmem %s32_s27, 512  ;;  %p276_p4 = scmp.lt.s32.totalorder %s32_s27, %s32_s27 }
   0xc   :  { %p272_p3 = scmp.ne.s32.totalorder %s32_s27, %s271_s6  ;;  %p277_p5 = scmp.lt.s32.totalorder %s271_s6, %s271_s6 }
   0xe   :  { %p278_p6 = por %p277_p5, %p276_p4 }
  0x10   :  { %p279_p7 = pnand %p278_p6, %p272_p3 }
  0x12   :  { %282 = shalt.err (!%p279_p7)
}
  0x13   :  { %s332_s12 = smov 128   ;;  %s333_s13 = smov 8  }
  0x14   :  { %37 = dma.hbm_to_vmem [thread:$0]  %s436_s1, 512, %s32_s27, [#allocation6], %s332_s12, %s332_s12, %s333_s13  }
  0x15   :  { %s334_s16 = smov [#allocation3]   ;;  %s335_s18 = smov [#allocation7]  }
  0x16   :  { %s22_s17 = sshll.u32 %s334_s16, 4  ;;  %s45_s19 = sshll.u32 %s335_s18, 4  ;;  %s23_s17 = int_to_ptr.vmem [resolvable:$true] %s22_s17  ;;  %s46_s19 = int_to_ptr.vmem [resolvable:$true] %s45_s19 }
  0x17   :  { %s283_s22 = scalar_lea.hbm %s435_s0, 128 }
  0x18   :  { %p284_p8 = scmp.ne.s32.totalorder %s435_s0, %s283_s22  ;;  %p287_p9 = scmp.lt.u32.totalorder %s283_s22, %s435_s0 }
  0x1a   :  { %p289_p10 = pnand %p287_p9, %p284_p8 }
  0x1c   :  { %292 = shalt.err (!%p289_p10)
}
  0x1d   :  { %s293_s1 = scalar_lea.vmem %s23_s17, 128  ;;  %p298_p12 = scmp.lt.s32.totalorder %s23_s17, %s23_s17 }
  0x1e   :  { %p294_p11 = scmp.ne.s32.totalorder %s23_s17, %s293_s1  ;;  %p299_p13 = scmp.lt.s32.totalorder %s293_s1, %s293_s1 }
  0x20   :  { %p300_p0 = por %p299_p13, %p298_p12 }
  0x22   :  { %p301_p1 = pnand %p300_p0, %p294_p11 }
  0x24   :  { %304 = shalt.err (!%p301_p1)
}
  0x25   :  { %25 = dma.hbm_to_vmem [thread:$0]  %s435_s0, 128, %s23_s17, [#allocation4]  }
  0x26   :  { %s305_s8 = scalar_lea.hbm %s438_s3, 1024 }
  0x27   :  { %p306_p2 = scmp.ne.s32.totalorder %s438_s3, %s305_s8  ;;  %p309_p3 = scmp.lt.u32.totalorder %s305_s8, %s438_s3 }
  0x29   :  { %p311_p4 = pnand %p309_p3, %p306_p2 }
  0x2b   :  { %314 = shalt.err (!%p311_p4)
}
  0x2c   :  { %s315_s14 = scalar_lea.vmem %s46_s19, 1024  ;;  %p320_p6 = scmp.lt.s32.totalorder %s46_s19, %s46_s19 }
  0x2d   :  { %p316_p5 = scmp.ne.s32.totalorder %s46_s19, %s315_s14  ;;  %p321_p7 = scmp.lt.s32.totalorder %s315_s14, %s315_s14 }
  0x2f   :  { %p322_p8 = por %p321_p7, %p320_p6 }
  0x31   :  { %p323_p9 = pnand %p322_p8, %p316_p5 }
  0x33   :  { %326 = shalt.err (!%p323_p9)
}
  0x34   :  { %51 = dma.hbm_to_vmem [thread:$0]  %s438_s3, 1024, %s46_s19, [#allocation6], %s332_s12, %s332_s12, %s333_s13  }
  0x35   :  { %327 = dma.done.wait [#allocation4], 128  }
  0x36   :  { %328 = vsyncadd [#allocation4], 4294967168 }
  0x37   :  { %329 = dma.done.wait [#allocation6], 1536  }
  0x38   :  { %330 = vsyncadd [#allocation6], 4294965760  ;;  %v336_v1 = vmov 0.0   ;;  %vm337_vm0 = vmmov 0   ;;  %v70_v2 = vld [vmem:[#allocation5] sm:$0xff]  ;;  %v71_v3 = vld [vmem:[#allocation5 + $0x8] sm:$0xff] }
  0x39   :  { %234 = vmatprep.subr.bf16.mxu0 %v336_v1  ;;  %238 = vmatprep.mubr.msk.bf16.mxu0 %vm337_vm0, %v336_v1  ;;  %v72_v4 = vld [vmem:[#allocation5 + $0x10] sm:$0xff]  ;;  %v74_v5 = vpack.c.bf16 %v71_v3, %v70_v2  ;;  %v73_v6 = vld [vmem:[#allocation5 + $0x18] sm:$0xff]  ;;  %v129_v7 = vld [vmem:[#allocation7] sm:$0xff]  ;;  %vm83_vm1 = vcmask 261120   ;;  %vm148_vm2 = vcmask 523264   ;;  %vm212_vm3 = vcmask 7168  }
  0x3a   :  { %242 = vmatprep.subr.bf16.mxu1 %v336_v1  ;;  %250 = vmatprep.mubr.msk.bf16.mxu1 %vm337_vm0, %v336_v1  ;;  %v130_v8 = vld [vmem:[#allocation7 + $0x8] sm:$0xff]  ;;  %v131_v9 = vld [vmem:[#allocation7 + $0x10] sm:$0xff]  ;;  %v132_v10 = vld [vmem:[#allocation7 + $0x18] sm:$0xff]  ;;  %v75_v11 = vpack.c.bf16 %v73_v6, %v72_v4 }
  0x3b   :  { %235 = vmatpush3.bf16.msra.mxu0 %v74_v5  ;;  %v68_v12 = vld [vmem:[#allocation3] sm:$0xff]  ;;  %v137_v13 = vpack.c.bf16 %v130_v8, %v129_v7  ;;  %v138_v14 = vpack.c.bf16 %v132_v10, %v131_v9  ;;  %v133_v16 = vld [vmem:[#allocation7 + $0x20] sm:$0xff]  ;;  %v134_v17 = vld [vmem:[#allocation7 + $0x28] sm:$0xff] }
  0x3c   :  { %236 = vmatprep.subr.bf16.mxu0 %v336_v1  ;;  %v69_v15 = vpack.c.bf16 %v68_v12, %v68_v12  ;;  %v139_v18 = vpack.c.bf16 %v134_v17, %v133_v16  ;;  %v135_v19 = vld [vmem:[#allocation7 + $0x30] sm:$0xff]  ;;  %v136_v20 = vld [vmem:[#allocation7 + $0x38] sm:$0xff] }
  0x3d   :  { %243 = vmatpush3.bf16.msra.mxu1 %v137_v13  ;;  %v140_v21 = vpack.c.bf16 %v136_v20, %v135_v19  ;;  %v220_v22 = vld [vmem:[%s437_s2] ss:$0 sm:$0xff] }
  0x3e   :  { %244 = vmatprep.subr.bf16.mxu1 %v336_v1  ;;  %v222_v30 = vld [vmem:[%s439_s4] ss:$0 sm:$0xff] }
  0x3f   :  { %237 = vmatpush3.bf16.msra.mxu0 %v75_v11  ;;  %v224_v35 = vld [vmem:[%s440_s5] ss:$0 sm:$0xff] }
  0x40   :  { %v225_v40 = vld [vmem:[#allocation2] ss:$0 sm:$0xff] }
  0x41   :  { %245 = vmatpush3.bf16.msra.mxu1 %v138_v14 }
  0x42   :  { %239 = vmatmul.mubr.msk.bf16.vlgmr.msra.gmra.mrb[0].mxu0 %vm83_vm1, %v69_v15  ;;  %246 = vmatprep.subr.bf16.mxu1 %v336_v1 }
  0x45   :  { %247 = vmatpush3.bf16.msra.mxu1 %v139_v18 }
  0x46   :  { %248 = vmatprep.subr.bf16.mxu1 %v336_v1 }
  0x49   :  { %249 = vmatpush3.bf16.msra.mxu1 %v140_v21 }
 0x115   :  { %v121_v23 = vpop.f32.mrb[0].mxu0 }
 0x116   :  { %v122_v24 = vadd.f32 %v220_v22, %v121_v23  ;;  %v240_v25 = vpop.f32.mrb[1].mxu0 }
 0x117   :  { %v124_v26 = vpop.f32.mrb[2].mxu0 }
 0x118   :  { %v127_v27 = vmax.f32 %v122_v24, 0.0  ;;  %v241_v28 = vpop.f32.mrb[3].mxu0 }
 0x11a   :  { %v128_v29 = vpack.c.bf16 %v127_v27, %v127_v27 }
 0x11c   :  { %251 = vmatmul.mubr.msk.bf16.vlgmr.msra.gmra.mrb[0].mxu1 %vm148_vm2, %v128_v29 }
 0x1ef   :  { %v186_v31 = vpop.f32.mrb[0].mxu1 }
 0x1f0   :  { %v187_v32 = vadd.f32 %v222_v30, %v186_v31  ;;  %v252_v33 = vpop.f32.mrb[1].mxu1 }
 0x1f1   :  { %v189_v34 = vpop.f32.mrb[2].mxu1 }
 0x1f2   :  { %v192_v36 = vmax.f32 %v187_v32, 0.0  ;;  %v253_v37 = vpop.f32.mrb[3].mxu1 }
 0x1f4   :  { %v200_v38 = vmul.f32 %v224_v35, %v192_v36 }
 0x1f6   :  { %v201_v39 = vsel %vm148_vm2, %v200_v38, 0.0 }
 0x1f7   :  { %202 = vadd.xlane.f32.xlu0 %v201_v39 }
 0x284   :  { %v203_v41 = vpop.xlane.xlu0 %202 }
 0x285   :  { %v211_v42 = vadd.f32 %v225_v40, %v203_v41 }
 0x287   :  { %213 = vst.msk [vmem:[%s442_s7] sm:$0xff] %vm212_vm3, %v211_v42 }
 0x288   :  { %218 = vsyncpa [#allocation4], 1 }
 0x289   :  { %219 = vsyncpa [#allocation6], 1 }

</bundles_post_ra>
